<compile_context>
chip_gen: v6e
topology: v6e:2x2x1
jax: 0.10.0
libtpu: 0.0.40
codegen_flags: <defaults>
</compile_context>

<pallas_src>
import jax
import jax.numpy as jnp
from jax.experimental import pallas as pl
from jax.experimental.pallas import tpu as pltpu


_LANE = 128     # lane width (last dim)
_SUBLANE = 8    # sublane count (second-to-last dim)


def _round_up(n: int, m: int) -> int:
    return ((n + m - 1) // m) * m


def _mlp_kernel(x_ref, w1_ref, b1_ref, w2_ref, b2_ref, w3_ref, b3_ref, o_ref):
    """One (TB, Din_pad) batch tile per grid step; weights are VMEM-resident.

    All matmuls take bf16 (compute dtype) inputs and accumulate in f32 on the
    MXU; biases are added in f32; output is stored f32.
    """
    x = x_ref[...]                       # (TB, Din_p) compute dtype (bf16)

    # Hoist bias loads once (single loads; no re-materialized broadcasts).
    b1 = b1_ref[...]                     # (1, Hp)  f32
    b2 = b2_ref[...]                     # (1, Hp)  f32
    b3 = b3_ref[...]                     # (1, Op)  f32

    # Layer 1: bf16-in / f32-accumulate MXU matmul, bias, ReLU.
    h1 = jnp.dot(x, w1_ref[...], preferred_element_type=jnp.float32)
    h1 = jnp.maximum(h1 + b1, 0.0)

    # Layer 2.
    h2 = jnp.dot(h1.astype(w2_ref.dtype), w2_ref[...],
                 preferred_element_type=jnp.float32)
    h2 = jnp.maximum(h2 + b2, 0.0)

    # Output layer (no activation).
    out = jnp.dot(h2.astype(w3_ref.dtype), w3_ref[...],
                  preferred_element_type=jnp.float32)
    o_ref[...] = (out + b3).astype(o_ref.dtype)


def mlp_forward(x_img, params, *, batch_tile=128, compute_dtype=jnp.bfloat16):
    """x_img: (B, C, H, W) float32 -> logits (B, output_shape) float32."""
    w1, b1, w2, b2, w3, b3 = params
    B = x_img.shape[0]
    # torch.nn.Flatten(): (B, C, H, W) -> (B, C*H*W)
    x = x_img.reshape(B, -1).astype(jnp.float32)

    d_in, hidden = w1.shape
    d_out = w3.shape[1]
    assert x.shape[1] == d_in
    assert w2.shape == (hidden, hidden) and w3.shape[0] == hidden

    # ---- lane padding (feature dims -> multiples of 128) -------------------
    d_in_p = _round_up(d_in, _LANE)
    hid_p = _round_up(hidden, _LANE)
    d_out_p = _round_up(d_out, _LANE)

    # ---- batch tiling (sublane-aligned, capped at batch_tile) --------------
    tb = min(batch_tile, _round_up(B, _SUBLANE))
    tb = _round_up(tb, _SUBLANE)
    b_p = _round_up(B, tb)
    grid = (b_p // tb,)

    # Zero padding preserves exact semantics: padded x rows / weight
    # rows-cols / bias entries contribute zeros, and padded outputs are
    # sliced off below.
    x_p = jnp.zeros((b_p, d_in_p), jnp.float32).at[:B, :d_in].set(x)
    x_p = x_p.astype(compute_dtype)

    def pad2(a, rows, cols):
        return jnp.zeros((rows, cols), jnp.float32).at[
            : a.shape[0], : a.shape[1]
        ].set(a)

    w1_p = pad2(w1, d_in_p, hid_p).astype(compute_dtype)
    w2_p = pad2(w2, hid_p, hid_p).astype(compute_dtype)
    w3_p = pad2(w3, hid_p, d_out_p).astype(compute_dtype)
    # Biases stay f32 (added after f32 accumulation), shaped (1, N) so they
    # broadcast over the batch sublanes.
    b1_p = pad2(b1.reshape(1, -1), 1, hid_p)
    b2_p = pad2(b2.reshape(1, -1), 1, hid_p)
    b3_p = pad2(b3.reshape(1, -1), 1, d_out_p)

    # Weights/biases: whole arrays, VMEM-resident across all grid steps.
    vmem_full = pl.BlockSpec(memory_space=pltpu.MemorySpace.VMEM)

    out_p = pl.pallas_call(
        _mlp_kernel,
        out_shape=jax.ShapeDtypeStruct((b_p, d_out_p), jnp.float32),
        grid=grid,
        in_specs=[
            pl.BlockSpec((tb, d_in_p), lambda i: (i, 0)),  # batch-tiled x
            vmem_full,  # w1
            vmem_full,  # b1
            vmem_full,  # w2
            vmem_full,  # b2
            vmem_full,  # w3
            vmem_full,  # b3
        ],
        out_specs=pl.BlockSpec((tb, d_out_p), lambda i: (i, 0)),
        compiler_params=pltpu.CompilerParams(
            dimension_semantics=("parallel",)  # megacore-shardable batch axis
        ),
    )(x_p, w1_p, b1_p, w2_p, b2_p, w3_p, b3_p)

    # Slice off batch / lane padding.
    return out_p[:B, :d_out]


def init_params(key, input_shape, hidden_units, output_shape):
    """Deterministic init mimicking torch.nn.Linear default (U[-1/sqrt(fan_in), +])."""
    ks = jax.random.split(key, 6)

    def linear(kw, kb, fan_in, fan_out):
        bound = 1.0 / jnp.sqrt(fan_in)
        # Stored as (fan_in, fan_out) so the kernel computes x @ W (equivalent
        # to torch's x @ W.T with W of shape (fan_out, fan_in)).
        w = jax.random.uniform(kw, (fan_in, fan_out), jnp.float32, -bound, bound)
        b = jax.random.uniform(kb, (fan_out,), jnp.float32, -bound, bound)
        return w, b

    w1, b1 = linear(ks[0], ks[1], input_shape, hidden_units)
    w2, b2 = linear(ks[2], ks[3], hidden_units, hidden_units)
    w3, b3 = linear(ks[4], ks[5], hidden_units, output_shape)
    return (w1, b1, w2, b2, w3, b3)


def _reference(x_img, params, compute_dtype=jnp.float32):
    """Pure-JAX reference; compute_dtype controls matmul input precision."""
    w1, b1, w2, b2, w3, b3 = params
    x = x_img.reshape(x_img.shape[0], -1)

    def mm(a, w):
        return jnp.dot(a.astype(compute_dtype), w.astype(compute_dtype),
                       preferred_element_type=jnp.float32)

    h1 = jnp.maximum(mm(x, w1) + b1, 0.0)
    h2 = jnp.maximum(mm(h1, w2) + b2, 0.0)
    return mm(h2, w3) + b3


if __name__ == "__main__":
    # Small shapes consistent with the module: a 1x16x16 "image" per example
    # => input_shape = 256, hidden_units = 32, output_shape = 10, batch = 2.
    B, C, H, W = 2, 1, 16, 16
    input_shape = C * H * W
    hidden_units = 32
    output_shape = 10

    key = jax.random.PRNGKey(0)
    k_x, k_p = jax.random.split(key)
    x_img = jax.random.normal(k_x, (B, C, H, W), dtype=jnp.float32)
    params = init_params(k_p, input_shape, hidden_units, output_shape)

    out = mlp_forward(x_img, params)
    out = jax.block_until_ready(out)
    assert out.shape == (B, output_shape)

    # Tight check against a reference that uses the same bf16-in / f32-acc
    # matmul precision as the kernel.
    ref_bf16 = _reference(x_img, params, compute_dtype=jnp.bfloat16)
    assert jnp.allclose(out, ref_bf16, atol=1e-2, rtol=1e-2), \
        "mismatch vs bf16-precision reference"

    # Looser check against the full-f32 reference (bf16 matmul-input rounding).
    ref_f32 = _reference(x_img, params, compute_dtype=jnp.float32)
    assert jnp.allclose(out, ref_f32, atol=5e-2, rtol=5e-2), \
        "mismatch vs f32 reference"

    print("KERNEL_OK")
</pallas_src>

<mosaic_0001>
module attributes {stable_mosaic.version = 11 : i64} {
  func.func @_mlp_kernel(%arg0: i32, %arg1: memref<8x256xbf16, #tpu.memory_space<vmem>>, %arg2: memref<256x128xbf16, #tpu.memory_space<vmem>>, %arg3: memref<1x128xf32, #tpu.memory_space<vmem>>, %arg4: memref<128x128xbf16, #tpu.memory_space<vmem>>, %arg5: memref<1x128xf32, #tpu.memory_space<vmem>>, %arg6: memref<128x128xbf16, #tpu.memory_space<vmem>>, %arg7: memref<1x128xf32, #tpu.memory_space<vmem>>, %arg8: memref<8x128xf32, #tpu.memory_space<vmem>>) attributes {dimension_semantics = [#tpu.dimension_semantics<parallel>], iteration_bounds = array<i64: 1>, scalar_prefetch = 0 : i64, scratch_operands = 0 : i64, tpu.core_type = #tpu.core_type<tc>, window_params = [{transform_indices = @transform_0, window_bounds = array<i64: 8, 256>}, {pipeline_mode = #tpu.pipeline_mode<synchronous>, transform_indices = @transform_1, window_bounds = array<i64: 256, 128>}, {pipeline_mode = #tpu.pipeline_mode<synchronous>, transform_indices = @transform_2, window_bounds = array<i64: 1, 128>}, {pipeline_mode = #tpu.pipeline_mode<synchronous>, transform_indices = @transform_3, window_bounds = array<i64: 128, 128>}, {pipeline_mode = #tpu.pipeline_mode<synchronous>, transform_indices = @transform_4, window_bounds = array<i64: 1, 128>}, {pipeline_mode = #tpu.pipeline_mode<synchronous>, transform_indices = @transform_5, window_bounds = array<i64: 128, 128>}, {pipeline_mode = #tpu.pipeline_mode<synchronous>, transform_indices = @transform_6, window_bounds = array<i64: 1, 128>}, {transform_indices = @transform_7, window_bounds = array<i64: 8, 128>}]} {
    %c0 = arith.constant 0 : index
    %c0_0 = arith.constant 0 : index
    %0 = vector.load %arg1[%c0, %c0_0] : memref<8x256xbf16, #tpu.memory_space<vmem>>, vector<8x256xbf16>
    %c0_1 = arith.constant 0 : index
    %c0_2 = arith.constant 0 : index
    %1 = vector.load %arg3[%c0_1, %c0_2] : memref<1x128xf32, #tpu.memory_space<vmem>>, vector<1x128xf32>
    %c0_3 = arith.constant 0 : index
    %c0_4 = arith.constant 0 : index
    %2 = vector.load %arg5[%c0_3, %c0_4] : memref<1x128xf32, #tpu.memory_space<vmem>>, vector<1x128xf32>
    %c0_5 = arith.constant 0 : index
    %c0_6 = arith.constant 0 : index
    %3 = vector.load %arg7[%c0_5, %c0_6] : memref<1x128xf32, #tpu.memory_space<vmem>>, vector<1x128xf32>
    %c0_7 = arith.constant 0 : index
    %c0_8 = arith.constant 0 : index
    %4 = vector.load %arg2[%c0_7, %c0_8] : memref<256x128xbf16, #tpu.memory_space<vmem>>, vector<256x128xbf16>
    %cst = arith.constant dense<0.000000e+00> : vector<8x128xf32>
    %5 = tpu.matmul %0, %4, %cst {dimension_numbers = #tpu.dot_dimension_numbers<[1], [0], [0], [1], [0, 0, 1, 1], [], []>} : vector<8x256xbf16>, vector<256x128xbf16>, vector<8x128xf32> -> vector<8x128xf32>
    %6 = vector.broadcast %1 : vector<1x128xf32> to vector<8x128xf32>
    %7 = arith.addf %5, %6 : vector<8x128xf32>
    %cst_9 = arith.constant 0.000000e+00 : f32
    %8 = vector.broadcast %cst_9 : f32 to vector<8x128xf32>
    %9 = arith.maximumf %7, %8 : vector<8x128xf32>
    %10 = arith.truncf %9 : vector<8x128xf32> to vector<8x128xbf16>
    %c0_10 = arith.constant 0 : index
    %c0_11 = arith.constant 0 : index
    %11 = vector.load %arg4[%c0_10, %c0_11] : memref<128x128xbf16, #tpu.memory_space<vmem>>, vector<128x128xbf16>
    %cst_12 = arith.constant dense<0.000000e+00> : vector<8x128xf32>
    %12 = tpu.matmul %10, %11, %cst_12 {dimension_numbers = #tpu.dot_dimension_numbers<[1], [0], [0], [1], [0, 0, 1, 1], [], []>} : vector<8x128xbf16>, vector<128x128xbf16>, vector<8x128xf32> -> vector<8x128xf32>
    %13 = vector.broadcast %2 : vector<1x128xf32> to vector<8x128xf32>
    %14 = arith.addf %12, %13 : vector<8x128xf32>
    %cst_13 = arith.constant 0.000000e+00 : f32
    %15 = vector.broadcast %cst_13 : f32 to vector<8x128xf32>
    %16 = arith.maximumf %14, %15 : vector<8x128xf32>
    %17 = arith.truncf %16 : vector<8x128xf32> to vector<8x128xbf16>
    %c0_14 = arith.constant 0 : index
    %c0_15 = arith.constant 0 : index
    %18 = vector.load %arg6[%c0_14, %c0_15] : memref<128x128xbf16, #tpu.memory_space<vmem>>, vector<128x128xbf16>
    %cst_16 = arith.constant dense<0.000000e+00> : vector<8x128xf32>
    %19 = tpu.matmul %17, %18, %cst_16 {dimension_numbers = #tpu.dot_dimension_numbers<[1], [0], [0], [1], [0, 0, 1, 1], [], []>} : vector<8x128xbf16>, vector<128x128xbf16>, vector<8x128xf32> -> vector<8x128xf32>
    %20 = vector.broadcast %3 : vector<1x128xf32> to vector<8x128xf32>
    %21 = arith.addf %19, %20 : vector<8x128xf32>
    %c0_17 = arith.constant 0 : index
    %c0_18 = arith.constant 0 : index
    %22 = vector.load %arg8[%c0_17, %c0_18] : memref<8x128xf32, #tpu.memory_space<vmem>>, vector<8x128xf32>
    tpu.vector_store %arg8[%c0_17, %c0_18], %21 {strides = array<i32>} : memref<8x128xf32, #tpu.memory_space<vmem>>, vector<8x128xf32>,
    return
  }
  func.func @transform_0(%arg0: i32) -> (i32, i32) {
    %c0_i32 = arith.constant 0 : i32
    %c0_i32_0 = arith.constant 0 : i32
    return %arg0, %c0_i32 : i32, i32
  }
  func.func @transform_1(%arg0: i32) -> (i32, i32) {
    %c0_i32 = arith.constant 0 : i32
    %c0_i32_0 = arith.constant 0 : i32
    %c0_i32_1 = arith.constant 0 : i32
    return %c0_i32, %c0_i32_0 : i32, i32
  }
  func.func @transform_2(%arg0: i32) -> (i32, i32) {
    %c0_i32 = arith.constant 0 : i32
    %c0_i32_0 = arith.constant 0 : i32
    %c0_i32_1 = arith.constant 0 : i32
    return %c0_i32, %c0_i32_0 : i32, i32
  }
  func.func @transform_3(%arg0: i32) -> (i32, i32) {
    %c0_i32 = arith.constant 0 : i32
    %c0_i32_0 = arith.constant 0 : i32
    %c0_i32_1 = arith.constant 0 : i32
    return %c0_i32, %c0_i32_0 : i32, i32
  }
  func.func @transform_4(%arg0: i32) -> (i32, i32) {
    %c0_i32 = arith.constant 0 : i32
    %c0_i32_0 = arith.constant 0 : i32
    %c0_i32_1 = arith.constant 0 : i32
    return %c0_i32, %c0_i32_0 : i32, i32
  }
  func.func @transform_5(%arg0: i32) -> (i32, i32) {
    %c0_i32 = arith.constant 0 : i32
    %c0_i32_0 = arith.constant 0 : i32
    %c0_i32_1 = arith.constant 0 : i32
    return %c0_i32, %c0_i32_0 : i32, i32
  }
  func.func @transform_6(%arg0: i32) -> (i32, i32) {
    %c0_i32 = arith.constant 0 : i32
    %c0_i32_0 = arith.constant 0 : i32
    %c0_i32_1 = arith.constant 0 : i32
    return %c0_i32, %c0_i32_0 : i32, i32
  }
  func.func @transform_7(%arg0: i32) -> (i32, i32) {
    %c0_i32 = arith.constant 0 : i32
    %c0_i32_0 = arith.constant 0 : i32
    return %arg0, %c0_i32 : i32, i32
  }
}

</mosaic_0001>

<bundles_post_ra>
// kernel: tpu_custom_call.1
= control target key start
LH: loop header
LB: loop body
LE: loop exit
PB: predicated region body
PF: predicated region fallthrough
CT: control target
= control target key end

     0   :  { %12 = vsyncpa [#allocation3], 0  ;;  %s876_s0 = inlined_call_operand.hbm [shape: bf16[8,256], index: 0, kind: input, shape index: {}]   ;;  %s877_s1 = inlined_call_operand.hbm [shape: bf16[256,128], index: 1, kind: input, shape index: {}]   ;;  %s878_s2 = inlined_call_operand.vmem [shape: f32[1,128], index: 2, kind: input, shape index: {}]   ;;  %s879_s3 = inlined_call_operand.hbm [shape: bf16[128,128], index: 3, kind: input, shape index: {}]   ;;  %s880_s4 = inlined_call_operand.vmem [shape: f32[1,128], index: 4, kind: input, shape index: {}]   ;;  %s881_s5 = inlined_call_operand.hbm [shape: bf16[128,128], index: 5, kind: input, shape index: {}]   ;;  %s882_s6 = inlined_call_operand.vmem [shape: f32[1,128], index: 6, kind: input, shape index: {}]   ;;  %s883_s7 = inlined_call_operand.hbm [shape: f32[8,128], index: 7, kind: output, shape index: {}]  }
   0x1   :  { %13 = vsyncpa [#allocation6], 0 }
   0x2   :  { %14 = vsyncpa [#allocation9], 0 }
   0x3   :  { %15 = vsyncpa [#allocation4], 0  ;;  %s776_s24 = smov [#allocation5]  }
   0x4   :  { %s31_s25 = sshll.u32 %s776_s24, 4  ;;  %s32_s25 = int_to_ptr.vmem [resolvable:$true] %s31_s25 }
   0x5   :  { %s676_s26 = scalar_lea.vmem %s32_s25, 2048  ;;  %p681_p1 = scmp.lt.s32.totalorder %s32_s25, %s32_s25 }
   0x6   :  { %p677_p0 = scmp.ne.s32.totalorder %s32_s25, %s676_s26  ;;  %p682_p2 = scmp.lt.s32.totalorder %s676_s26, %s676_s26 }
   0x8   :  { %p683_p3 = por %p682_p2, %p681_p1 }
   0xa   :  { %p684_p4 = pnand %p683_p3, %p677_p0 }
   0xc   :  { %687 = shalt.err (!%p684_p4)
}
   0xd   :  { %s777_s27 = smov 64   ;;  %s778_s28 = smov 4  }
   0xe   :  { %37 = dma.hbm_to_vmem [thread:$0]  %s877_s1, 2048, %s32_s25, [#allocation6], %s777_s27, %s777_s27, %s778_s28  }
   0xf   :  { %s779_s8 = smov [#allocation2]   ;;  %s780_s10 = smov [#allocation7]  }
  0x10   :  { %s22_s9 = sshll.u32 %s779_s8, 4  ;;  %s45_s11 = sshll.u32 %s780_s10, 4  ;;  %s23_s9 = int_to_ptr.vmem [resolvable:$true] %s22_s9  ;;  %s46_s11 = int_to_ptr.vmem [resolvable:$true] %s45_s11 }
  0x11   :  { %s696_s12 = scalar_lea.vmem %s23_s9, 128  ;;  %p701_p6 = scmp.lt.s32.totalorder %s23_s9, %s23_s9 }
  0x12   :  { %p697_p5 = scmp.ne.s32.totalorder %s23_s9, %s696_s12  ;;  %p702_p7 = scmp.lt.s32.totalorder %s696_s12, %s696_s12 }
  0x14   :  { %p703_p8 = por %p702_p7, %p701_p6 }
  0x16   :  { %p704_p9 = pnand %p703_p8, %p697_p5 }
  0x18   :  { %707 = shalt.err (!%p704_p9)
}
  0x19   :  { %25 = dma.hbm_to_vmem [thread:$0]  %s876_s0, 128, %s23_s9, [#allocation3]  }
  0x1a   :  { %s716_s15 = scalar_lea.vmem %s46_s11, 1024  ;;  %p721_p11 = scmp.lt.s32.totalorder %s46_s11, %s46_s11 }
  0x1b   :  { %p717_p10 = scmp.ne.s32.totalorder %s46_s11, %s716_s15  ;;  %p722_p12 = scmp.lt.s32.totalorder %s716_s15, %s716_s15 }
  0x1d   :  { %p723_p13 = por %p722_p12, %p721_p11 }
  0x1f   :  { %p724_p0 = pnand %p723_p13, %p717_p10 }
  0x21   :  { %727 = shalt.err (!%p724_p0)
}
  0x22   :  { %51 = dma.hbm_to_vmem [thread:$0]  %s879_s3, 1024, %s46_s11, [#allocation6], %s777_s27, %s777_s27, %s778_s28  }
  0x23   :  { %s781_s17 = smov [#allocation8]  }
  0x24   :  { %s59_s18 = sshll.u32 %s781_s17, 4  ;;  %s60_s18 = int_to_ptr.vmem [resolvable:$true] %s59_s18 }
  0x25   :  { %s736_s19 = scalar_lea.vmem %s60_s18, 1024  ;;  %p741_p2 = scmp.lt.s32.totalorder %s60_s18, %s60_s18 }
  0x26   :  { %p737_p1 = scmp.ne.s32.totalorder %s60_s18, %s736_s19  ;;  %p742_p3 = scmp.lt.s32.totalorder %s736_s19, %s736_s19 }
  0x28   :  { %p743_p4 = por %p742_p3, %p741_p2 }
  0x2a   :  { %p744_p5 = pnand %p743_p4, %p737_p1 }
  0x2c   :  { %747 = shalt.err (!%p744_p5)
}
  0x2d   :  { %65 = dma.hbm_to_vmem [thread:$0]  %s881_s5, 1024, %s60_s18, [#allocation9], %s777_s27, %s777_s27, %s778_s28  }
  0x2e   :  { %768 = dma.done.wait [#allocation3], 128  }
  0x2f   :  { %769 = vsyncadd [#allocation3], 4294967168 }
  0x30   :  { %770 = dma.done.wait [#allocation6], 3072  }
  0x31   :  { %771 = vsyncadd [#allocation6], 4294964224 }
  0x32   :  { %772 = dma.done.wait [#allocation9], 1024  }
  0x33   :  { %773 = vsyncadd [#allocation9], 4294966272  ;;  %v782_v0 = vmov 0.0   ;;  %v634_v1 = vld [vmem:[#allocation5 + $0x78] sm:$0xff]   ;;  %v636_v3 = vld [vmem:[#allocation5 + $0x70] sm:$0xff]   ;;  %vm783_vm0 = vmmov 0  }
  0x34   :  { %585 = vmatprep.subr.bf16.mxu1 %v782_v0  ;;  %v635_v2 = vld [vmem:[#allocation5 + $0x38] sm:$0xff]   ;;  %545 = vmatprep.subr.bf16.mxu0 %v634_v1  ;;  %v637_v4 = vld [vmem:[#allocation5 + $0x30] sm:$0xff]   ;;  %v638_v5 = vld [vmem:[#allocation5 + $0x68] sm:$0xff]   ;;  %s784_s24 = smov [#allocation10]  }
  0x35   :  { %546 = vmatpush3.bf16.msra.mxu0 %v635_v2  ;;  %v639_v6 = vld [vmem:[#allocation5 + $0x28] sm:$0xff]   ;;  %v640_v7 = vld [vmem:[#allocation5 + $0x60] sm:$0xff]   ;;  %v642_v9 = vld [vmem:[#allocation5 + $0x58] sm:$0xff]   ;;  %601 = vmatprep.mubr.msk.bf16.mxu1 %vm783_vm0, %v782_v0  ;;  %s497_s25 = sshll.u32 %s784_s24, 4  ;;  %s498_s25 = int_to_ptr.vmem [resolvable:$true] %s497_s25 }
  0x36   :  { %547 = vmatprep.subr.bf16.mxu0 %v636_v3  ;;  %v641_v8 = vld [vmem:[#allocation5 + $0x20] sm:$0xff]   ;;  %v643_v10 = vld [vmem:[#allocation5 + $0x18] sm:$0xff]   ;;  %v644_v11 = vld [vmem:[#allocation5 + $0x50] sm:$0xff]   ;;  %p753_p7 = scmp.lt.s32.totalorder %s498_s25, %s498_s25 }
  0x37   :  { %v81_v12 = vld [vmem:[#allocation2] sm:$0xff]  ;;  %v645_v15 = vld [vmem:[#allocation5 + $0x10] sm:$0xff]   ;;  %v646_v16 = vld [vmem:[#allocation5 + $0x48] sm:$0xff]  }
  0x38   :  { %v510_v13 = vcombine.high %v81_v12, %v81_v12  ;;  %v652_v14 = vld [vmem:[#allocation7 + $0x38] sm:$0xff]   ;;  %v653_v17 = vld [vmem:[#allocation7 + $0x30] sm:$0xff]   ;;  %v647_v18 = vld [vmem:[#allocation5 + $0x8] sm:$0xff]   ;;  %v509_v23 = vcombine.low %v81_v12, %v81_v12 }
  0x39   :  { %548 = vmatpush3.bf16.msra.mxu0 %v637_v4  ;;  %586 = vmatpush3.bf16.msra.mxu1 %v652_v14  ;;  %v648_v19 = vld [vmem:[#allocation5 + $0x40] sm:$0xff]   ;;  %v654_v20 = vld [vmem:[#allocation7 + $0x28] sm:$0xff]   ;;  %v656_v24 = vld [vmem:[#allocation7 + $0x18] sm:$0xff]  }
  0x3a   :  { %549 = vmatprep.subr.bf16.mxu0 %v638_v5  ;;  %258 = vmatprep.mubr.bf16.mxu0 %v510_v13  ;;  %v649_v21 = vld [vmem:[#allocation5] sm:$0xff]   ;;  %v657_v25 = vld [vmem:[#allocation7 + $0x10] sm:$0xff]   ;;  %v658_v26 = vld [vmem:[#allocation7 + $0x8] sm:$0xff]  }
  0x3b   :  { %587 = vmatprep.subr.bf16.mxu1 %v782_v0  ;;  %v655_v22 = vld [vmem:[#allocation7 + $0x20] sm:$0xff]   ;;  %v660_v28 = vld [vmem:[#allocation8 + $0x38] sm:$0xff]   ;;  %v661_v29 = vld [vmem:[#allocation8 + $0x30] sm:$0xff]  }
  0x3c   :  { %v659_v27 = vld [vmem:[#allocation7] sm:$0xff]   ;;  %v662_v30 = vld [vmem:[#allocation8 + $0x28] sm:$0xff]   ;;  %v664_v32 = vld [vmem:[#allocation8 + $0x18] sm:$0xff]  }
  0x3d   :  { %550 = vmatpush3.bf16.msra.mxu0 %v639_v6  ;;  %588 = vmatpush3.bf16.msra.mxu1 %v653_v17  ;;  %v663_v31 = vld [vmem:[#allocation8 + $0x20] sm:$0xff]   ;;  %v665_v33 = vld [vmem:[#allocation8 + $0x10] sm:$0xff]   ;;  %v508_v35 = vld [vmem:[%s878_s2] ss:$0 sm:$0xff] }
  0x3e   :  { %551 = vmatprep.subr.bf16.mxu0 %v640_v7  ;;  %589 = vmatprep.subr.bf16.mxu1 %v782_v0  ;;  %v666_v43 = vld [vmem:[#allocation8 + $0x8] sm:$0xff]   ;;  %v667_v44 = vld [vmem:[#allocation8] sm:$0xff]   ;;  %v527_v45 = vld [vmem:[%s880_s4] ss:$0 sm:$0xff]  ;;  %s748_s4 = scalar_lea.vmem %s498_s25, 128 }
  0x3f   :  { %v536_v53 = vld [vmem:[%s882_s6] ss:$0 sm:$0xff]  ;;  %p749_p6 = scmp.ne.s32.totalorder %s498_s25, %s748_s4  ;;  %p754_p8 = scmp.lt.s32.totalorder %s748_s4, %s748_s4 }
  0x41   :  { %552 = vmatpush3.bf16.msra.mxu0 %v641_v8  ;;  %590 = vmatpush3.bf16.msra.mxu1 %v654_v20  ;;  %p755_p9 = por %p754_p8, %p753_p7 }
  0x42   :  { %553 = vmatprep.subr.bf16.mxu0 %v642_v9  ;;  %591 = vmatprep.subr.bf16.mxu1 %v782_v0 }
  0x43   :  { %p756_p10 = pnand %p755_p9, %p749_p6 }
  0x45   :  { %554 = vmatpush3.bf16.msra.mxu0 %v643_v10  ;;  %592 = vmatpush3.bf16.msra.mxu1 %v655_v22 }
  0x46   :  { %555 = vmatprep.subr.bf16.mxu0 %v644_v11  ;;  %593 = vmatprep.subr.bf16.mxu1 %v782_v0 }
  0x49   :  { %556 = vmatpush3.bf16.msra.mxu0 %v645_v15  ;;  %594 = vmatpush3.bf16.msra.mxu1 %v656_v24 }
  0x4a   :  { %557 = vmatprep.subr.bf16.mxu0 %v646_v16  ;;  %595 = vmatprep.subr.bf16.mxu1 %v782_v0 }
  0x4d   :  { %558 = vmatpush3.bf16.msra.mxu0 %v647_v18  ;;  %596 = vmatpush3.bf16.msra.mxu1 %v657_v25 }
  0x4e   :  { %559 = vmatprep.subr.bf16.mxu0 %v648_v19  ;;  %597 = vmatprep.subr.bf16.mxu1 %v782_v0 }
  0x51   :  { %560 = vmatpush3.bf16.msra.mxu0 %v649_v21  ;;  %598 = vmatpush3.bf16.msra.mxu1 %v658_v26 }
  0x52   :  { %605 = vmatprep.subr.bf16.mxu0 %v782_v0  ;;  %599 = vmatprep.subr.bf16.mxu1 %v782_v0 }
  0x54   :  { %259 = vmatmul.mubr.bf16.vlgmr.msra.gmra.mxu0 %v509_v23 }
  0x55   :  { %600 = vmatpush3.bf16.msra.mxu1 %v659_v27  ;;  %621 = vmatprep.mubr.msk.bf16.mxu0 %vm783_vm0, %v782_v0 }
  0x56   :  { %606 = vmatpush3.bf16.msra.mxu0 %v660_v28 }
  0x57   :  { %607 = vmatprep.subr.bf16.mxu0 %v782_v0 }
  0x5a   :  { %608 = vmatpush3.bf16.msra.mxu0 %v661_v29 }
  0x5b   :  { %609 = vmatprep.subr.bf16.mxu0 %v782_v0 }
  0x5e   :  { %610 = vmatpush3.bf16.msra.mxu0 %v662_v30 }
  0x5f   :  { %611 = vmatprep.subr.bf16.mxu0 %v782_v0 }
  0x62   :  { %612 = vmatpush3.bf16.msra.mxu0 %v663_v31 }
  0x63   :  { %613 = vmatprep.subr.bf16.mxu0 %v782_v0 }
  0x66   :  { %614 = vmatpush3.bf16.msra.mxu0 %v664_v32 }
  0x67   :  { %615 = vmatprep.subr.bf16.mxu0 %v782_v0 }
  0x6a   :  { %616 = vmatpush3.bf16.msra.mxu0 %v665_v33 }
  0x6b   :  { %617 = vmatprep.subr.bf16.mxu0 %v782_v0 }
  0x6e   :  { %618 = vmatpush3.bf16.msra.mxu0 %v666_v43 }
  0x6f   :  { %619 = vmatprep.subr.bf16.mxu0 %v782_v0 }
  0x72   :  { %620 = vmatpush3.bf16.msra.mxu0 %v667_v44 }
 0x114   :  { %v561_v34 = vpop.f32.mrf.mxu0 }
 0x116   :  { %v562_v36 = vpop.f32.mrf.mxu0 }
 0x117   :  { %v563_v37 = vadd.f32 %v562_v36, %v561_v34 }
 0x118   :  { %v564_v38 = vpop.f32.mrf.mxu0 }
 0x119   :  { %v261_v39 = vadd.f32 %v563_v37, %v508_v35 }
 0x11a   :  { %v565_v40 = vpop.f32.mrf.mxu0 }
 0x11b   :  { %v266_v41 = vmax.f32 %v261_v39, 0.0 }
 0x11d   :  { %v267_v42 = vpack.c.bf16 %v266_v41, %v266_v41 }
 0x11f   :  { %602 = vmatmul.mubr.bf16.vlgmr.msra.gmra.mxu1 %v267_v42 }
 0x1df   :  { %v372_v46 = vpop.f32.mrf.mxu1 }
 0x1e0   :  { %v373_v47 = vadd.f32 %v527_v45, %v372_v46 }
 0x1e1   :  { %v603_v48 = vpop.f32.mrf.mxu1 }
 0x1e2   :  { %v378_v49 = vmax.f32 %v373_v47, 0.0 }
 0x1e3   :  { %v375_v50 = vpop.f32.mrf.mxu1 }
 0x1e4   :  { %v379_v51 = vpack.c.bf16 %v378_v49, %v378_v49 }
 0x1e5   :  { %v604_v52 = vpop.f32.mrf.mxu1 }
 0x1e6   :  { %622 = vmatmul.mubr.bf16.vlgmr.msra.gmra.mxu0 %v379_v51 }
 0x2a6   :  { %v484_v54 = vpop.f32.mrf.mxu0 }
 0x2a7   :  { %v485_v55 = vadd.f32 %v536_v53, %v484_v54 }
 0x2a8   :  { %v623_v56 = vpop.f32.mrf.mxu0 }
 0x2a9   :  { %490 = vst [vmem:[#allocation10] sm:$0xff] %v485_v55 }
 0x2aa   :  { %v487_v57 = vpop.f32.mrf.mxu0 }
 0x2ab   :  { %759 = shalt.err (!%p756_p10)
}
 0x2ac   :  { %500 = dma.vmem_to_hbm [thread:$0]  %s498_s25, 128, %s883_s7, [#allocation4]   ;;  %v624_v58 = vpop.f32.mrf.mxu0 }
 0x2ad   :  { %774 = dma.done.wait [#allocation4], 128  }
 0x2ae   :  { %775 = vsyncadd [#allocation4], 4294967168 }
 0x2af   :  { %504 = vsyncpa [#allocation3], 1 }
 0x2b0   :  { %505 = vsyncpa [#allocation6], 1 }
 0x2b1   :  { %506 = vsyncpa [#allocation9], 1 }
 0x2b2   :  { %507 = vsyncpa [#allocation4], 1 }

</bundles_post_ra>
